<compile_context>
chip_gen: v5e
topology: v5e:2x2
jax: 0.10.0
libtpu: 0.0.40
codegen_flags: <defaults>
</compile_context>

<pallas_src>
import jax
import jax.numpy as jnp
from jax.experimental import pallas as pl
from jax.experimental.pallas import tpu as pltpu

_SUBLANE = 8
# Conservative tile-selection budget / scoped-VMEM request: safe on v5e/v6e
# (128 MiB physical, 16/32 MiB scoped default) and v7x (64 MiB physical).
_VMEM_TILE_BUDGET = 24 * 1024 * 1024
_VMEM_LIMIT_BYTES = 40 * 1024 * 1024


# --------------------------------------------------------------------------- #
# Kernel
# --------------------------------------------------------------------------- #
def _make_sdpa_kernel(score_dtype, accumulate_in_output):
    """Build the kernel body, specialized on the score dtype and accumulator mode."""

    if accumulate_in_output:
        # f32 output: the output block is resident across the Sk grid axis, so it
        # doubles as the f32 accumulator — no scratch, no epilogue copy.
        def kernel(q_ref, k_ref, v_ref, o_ref):
            kk = pl.program_id(2)

            @pl.when(kk == 0)
            def _():
                o_ref[...] = jnp.zeros_like(o_ref)

            # scores = q @ k^T (contract last dims; no materialized transpose)
            s = jax.lax.dot_general(
                q_ref[0], k_ref[0],
                dimension_numbers=(((1,), (1,)), ((), ())),
                preferred_element_type=jnp.float32,
            ).astype(score_dtype)                      # (tq, tk)

            # partial output = scores @ v, f32 MXU accumulation into o_ref
            o_ref[0] += jax.lax.dot_general(
                s, v_ref[0],
                dimension_numbers=(((1,), (0,)), ((), ())),
                preferred_element_type=jnp.float32,
            )

        return kernel

    # Low-precision output: accumulate in an f32 VMEM scratch, cast on writeback.
    def kernel(q_ref, k_ref, v_ref, o_ref, acc_ref):
        kk = pl.program_id(2)

        @pl.when(kk == 0)
        def _():
            acc_ref[...] = jnp.zeros_like(acc_ref)

        s = jax.lax.dot_general(
            q_ref[0], k_ref[0],
            dimension_numbers=(((1,), (1,)), ((), ())),
            preferred_element_type=jnp.float32,
        ).astype(score_dtype)                          # (tq, tk)

        acc_ref[...] += jax.lax.dot_general(
            s, v_ref[0],
            dimension_numbers=(((1,), (0,)), ((), ())),
            preferred_element_type=jnp.float32,
        )

        @pl.when(kk == pl.num_programs(2) - 1)
        def _():
            o_ref[0] = acc_ref[...].astype(o_ref.dtype)

    return kernel


# --------------------------------------------------------------------------- #
# Tile selection (VMEM-budgeted, generation-conservative)
# --------------------------------------------------------------------------- #
def _round_up(x, m):
    return ((x + m - 1) // m) * m


def _tile_candidates(full_dim, cap):
    """Descending candidate tile sizes (multiples of 8), largest first."""
    cands = []
    if full_dim <= cap:
        cands.append(full_dim)
    for t in (2048, 1024, 512, 256, 128, 64, 32, 16, 8):
        if t < full_dim and t <= cap:
            cands.append(t)
    if not cands:
        cands.append(_SUBLANE)
    return cands


def _tile_vmem_bytes(tq, tk, D, Dv, in_isz, out_isz, use_scratch, score_isz):
    # Double-buffered input / output blocks.
    blocks = 2 * (tq * D * in_isz + tk * D * in_isz
                  + tk * Dv * in_isz + tq * Dv * out_isz)
    scratch = tq * Dv * 4 if use_scratch else 0
    # f32 score intermediate (+ low-precision copy when scores are cast down).
    scores = tq * tk * (4 + (score_isz if score_isz < 4 else 0))
    return blocks + scratch + scores


def _select_tiles(Sq, Sk, D, Dv, in_isz, out_isz, use_scratch, score_isz, B,
                  max_tq, max_tk):
    sq_full = _round_up(Sq, _SUBLANE)
    sk_full = _round_up(Sk, _SUBLANE)

    tq, tk = _SUBLANE, _SUBLANE
    found = False
    # Grow the Q tile first (K/V HBM traffic scales as 1/tq), then the largest
    # Sk tile that still fits — ideally all of Sk, so K/V are read once.
    for cand_q in _tile_candidates(sq_full, max_tq):
        for cand_k in _tile_candidates(sk_full, max_tk):
            if _tile_vmem_bytes(cand_q, cand_k, D, Dv, in_isz, out_isz,
                                use_scratch, score_isz) <= _VMEM_TILE_BUDGET:
                tq, tk = cand_q, cand_k
                found = True
                break
        if found:
            break

    # Keep both v7x TensorCores busy: need >= 2 points on the parallel axes.
    if B * (_round_up(Sq, tq) // tq) < 2 and sq_full >= 2 * _SUBLANE:
        tq = _round_up((sq_full + 1) // 2, _SUBLANE)

    return tq, tk


def _pad_axis_to(x, axis, target):
    pad = target - x.shape[axis]
    if pad == 0:
        return x
    widths = [(0, 0)] * x.ndim
    widths[axis] = (0, pad)
    return jnp.pad(x, widths)


# --------------------------------------------------------------------------- #
# Wrapper
# --------------------------------------------------------------------------- #
def scaled_dot_product_attention(q, k, v, *, max_tq=2048, max_tk=2048):
    """q: (B, Sq, D), k: (B, Sk, D), v: (B, Sk, Dv) -> (B, Sq, Dv)."""
    B, Sq, D = q.shape
    Bk, Sk, Dk = k.shape
    Bv, Skv, Dv = v.shape
    assert Bk == B and Bv == B and Dk == D and Skv == Sk
    assert k.dtype == q.dtype and v.dtype == q.dtype

    in_dtype = jnp.dtype(q.dtype)
    out_dtype = in_dtype
    low_precision = in_dtype in (jnp.dtype(jnp.bfloat16), jnp.dtype(jnp.float16))
    # Flash-attention style: for bf16/fp16 inputs cast the *scores* down so both
    # matmuls run at the MXU's full low-precision rate (with f32 accumulation);
    # keep the exact f32 path for f32 inputs.
    score_dtype = in_dtype if low_precision else jnp.dtype(jnp.float32)
    accumulate_in_output = out_dtype == jnp.dtype(jnp.float32)

    in_isz = in_dtype.itemsize
    out_isz = out_dtype.itemsize

    tq, tk = _select_tiles(Sq, Sk, D, Dv, in_isz, out_isz,
                           not accumulate_in_output,
                           jnp.dtype(score_dtype).itemsize,
                           B, max_tq, max_tk)

    # Pad sequence dims to a multiple of their tile (zero padding is exact for
    # this op: zero K rows give zero scores, zero V rows contribute zero, padded
    # Q rows are sliced off).  D / Dv stay unpadded (full-extent trailing dims).
    Sq_p = _round_up(Sq, tq)
    Sk_p = _round_up(Sk, tk)
    qp = _pad_axis_to(q, 1, Sq_p)
    kp = _pad_axis_to(k, 1, Sk_p)
    vp = _pad_axis_to(v, 1, Sk_p)

    grid_q = Sq_p // tq
    grid_k = Sk_p // tk
    grid = (B, grid_q, grid_k)

    # K/V are re-fetched once per Q tile; keep the scheduler hint honest.
    cost = pl.CostEstimate(
        flops=2 * B * Sq_p * Sk_p * (D + Dv),
        transcendentals=0,
        bytes_accessed=(B * Sq_p * D * in_isz
                        + grid_q * B * Sk_p * (D + Dv) * in_isz
                        + B * Sq_p * Dv * out_isz),
    )

    kernel = _make_sdpa_kernel(score_dtype, accumulate_in_output)
    scratch_shapes = ([] if accumulate_in_output
                      else [pltpu.VMEM((tq, Dv), jnp.float32)])

    out_p = pl.pallas_call(
        kernel,
        out_shape=jax.ShapeDtypeStruct((B, Sq_p, Dv), out_dtype),
        grid_spec=pltpu.PrefetchScalarGridSpec(
            num_scalar_prefetch=0,
            grid=grid,
            in_specs=[
                # Q: resident across the Sk (reduction) axis.
                pl.BlockSpec((1, tq, D), lambda b, i, kk: (b, i, 0)),
                # K / V: independent of the Sq-tile index (fully resident when
                # Sk fits a single tile, i.e. grid_k == 1).
                pl.BlockSpec((1, tk, D), lambda b, i, kk: (b, kk, 0)),
                pl.BlockSpec((1, tk, Dv), lambda b, i, kk: (b, kk, 0)),
            ],
            out_specs=pl.BlockSpec((1, tq, Dv), lambda b, i, kk: (b, i, 0)),
            scratch_shapes=scratch_shapes,
        ),
        compiler_params=pltpu.CompilerParams(
            dimension_semantics=("parallel", "parallel", "arbitrary"),
            vmem_limit_bytes=_VMEM_LIMIT_BYTES,
        ),
        cost_estimate=cost,
    )(qp, kp, vp)

    return out_p[:, :Sq, :] if Sq_p != Sq else out_p


# --------------------------------------------------------------------------- #
# Self-test
# --------------------------------------------------------------------------- #
if __name__ == "__main__":
    key = jax.random.PRNGKey(0)
    kq, kk_, kv = jax.random.split(key, 3)

    # 1) Small aligned case, f32 (direct-accumulate-into-output path).
    B, Sq, Sk, D, Dv = 2, 8, 8, 32, 32
    q = jax.random.normal(kq, (B, Sq, D), dtype=jnp.float32)
    k = jax.random.normal(kk_, (B, Sk, D), dtype=jnp.float32)
    v = jax.random.normal(kv, (B, Sk, Dv), dtype=jnp.float32)
    out = scaled_dot_product_attention(q, k, v)
    jax.block_until_ready(out)
    ref = jnp.einsum("bqk,bkd->bqd", jnp.einsum("bqd,bkd->bqk", q, k), v)
    assert out.shape == (B, Sq, Dv)
    assert jnp.allclose(out, ref, atol=1e-4, rtol=1e-4)

    # 2) Ragged shapes forced onto a multi-tile grid (exercises the pad-to-tile
    #    correctness fix and cross-tile accumulation over Sq and Sk).
    B2, Sq2, Sk2, D2, Dv2 = 2, 40, 40, 16, 24
    q2 = jax.random.normal(kq, (B2, Sq2, D2), dtype=jnp.float32)
    k2 = jax.random.normal(kk_, (B2, Sk2, D2), dtype=jnp.float32)
    v2 = jax.random.normal(kv, (B2, Sk2, Dv2), dtype=jnp.float32)
    out2 = scaled_dot_product_attention(q2, k2, v2, max_tq=16, max_tk=16)
    jax.block_until_ready(out2)
    ref2 = jnp.einsum("bqk,bkd->bqd", jnp.einsum("bqd,bkd->bqk", q2, k2), v2)
    assert out2.shape == (B2, Sq2, Dv2)
    assert jnp.allclose(out2, ref2, atol=1e-4, rtol=1e-4)

    # 3) bf16 path (scores cast to bf16 for the second matmul, scratch accumulator).
    qb, kb, vb = (x.astype(jnp.bfloat16) for x in (q, k, v))
    outb = scaled_dot_product_attention(qb, kb, vb)
    jax.block_until_ready(outb)
    refb = jnp.einsum(
        "bqk,bkd->bqd",
        jnp.einsum("bqd,bkd->bqk", qb.astype(jnp.float32), kb.astype(jnp.float32)),
        vb.astype(jnp.float32))
    assert outb.shape == (B, Sq, Dv)
    assert jnp.allclose(outb.astype(jnp.float32), refb, atol=1.0, rtol=1e-1)

    print("KERNEL_OK")
</pallas_src>

<mosaic_0001>
module attributes {stable_mosaic.version = 11 : i64} {
  func.func @kernel(%arg0: i32, %arg1: i32, %arg2: i32, %arg3: memref<1x8x32xf32, #tpu.memory_space<vmem>>, %arg4: memref<1x8x32xf32, #tpu.memory_space<vmem>>, %arg5: memref<1x8x32xf32, #tpu.memory_space<vmem>>, %arg6: memref<1x8x32xf32, #tpu.memory_space<vmem>>) attributes {dimension_semantics = [#tpu.dimension_semantics<parallel>, #tpu.dimension_semantics<parallel>, #tpu.dimension_semantics<arbitrary>], iteration_bounds = array<i64: 2, 1, 1>, scalar_prefetch = 0 : i64, scratch_operands = 0 : i64, tpu.core_type = #tpu.core_type<tc>, window_params = [{transform_indices = @transform_0, window_bounds = array<i64: 1, 8, 32>}, {transform_indices = @transform_1, window_bounds = array<i64: 1, 8, 32>}, {transform_indices = @transform_2, window_bounds = array<i64: 1, 8, 32>}, {transform_indices = @transform_3, window_bounds = array<i64: 1, 8, 32>}]} {
    %c0_i32 = arith.constant 0 : i32
    %0 = arith.cmpi eq, %arg2, %c0_i32 : i32
    %1 = arith.extui %0 : i1 to i32
    %c0_i32_0 = arith.constant 0 : i32
    %2 = arith.cmpi ne, %1, %c0_i32_0 : i32
    scf.if %2 {
      %cst_16 = arith.constant 0.000000e+00 : f32
      %17 = vector.broadcast %cst_16 : f32 to vector<1x8x32xf32>
      %c0_17 = arith.constant 0 : index
      %c0_18 = arith.constant 0 : index
      %c0_19 = arith.constant 0 : index
      %18 = vector.load %arg6[%c0_17, %c0_18, %c0_19] : memref<1x8x32xf32, #tpu.memory_space<vmem>>, vector<1x8x32xf32>
      tpu.vector_store %arg6[%c0_17, %c0_18, %c0_19], %17 {strides = array<i32>} : memref<1x8x32xf32, #tpu.memory_space<vmem>>, vector<1x8x32xf32>,
    } else {
    }
    %c0 = arith.constant 0 : index
    %c0_1 = arith.constant 0 : index
    %c0_2 = arith.constant 0 : index
    %3 = vector.load %arg3[%c0, %c0_1, %c0_2] : memref<1x8x32xf32, #tpu.memory_space<vmem>>, vector<1x8x32xf32>
    %4 = vector.shape_cast %3 : vector<1x8x32xf32> to vector<8x32xf32>
    %c0_3 = arith.constant 0 : index
    %c0_4 = arith.constant 0 : index
    %c0_5 = arith.constant 0 : index
    %5 = vector.load %arg4[%c0_3, %c0_4, %c0_5] : memref<1x8x32xf32, #tpu.memory_space<vmem>>, vector<1x8x32xf32>
    %6 = vector.shape_cast %5 : vector<1x8x32xf32> to vector<8x32xf32>
    %cst = arith.constant dense<0.000000e+00> : vector<8x8xf32>
    %7 = tpu.matmul %4, %6, %cst {dimension_numbers = #tpu.dot_dimension_numbers<[1], [1], [0], [0], [0, 0, 1, 0], [], []>} : vector<8x32xf32>, vector<8x32xf32>, vector<8x8xf32> -> vector<8x8xf32>
    %c0_6 = arith.constant 0 : index
    %c0_7 = arith.constant 0 : index
    %c0_8 = arith.constant 0 : index
    %8 = vector.load %arg6[%c0_6, %c0_7, %c0_8] : memref<1x8x32xf32, #tpu.memory_space<vmem>>, vector<1x8x32xf32>
    %9 = vector.shape_cast %8 : vector<1x8x32xf32> to vector<8x32xf32>
    %c0_9 = arith.constant 0 : index
    %c0_10 = arith.constant 0 : index
    %c0_11 = arith.constant 0 : index
    %10 = vector.load %arg5[%c0_9, %c0_10, %c0_11] : memref<1x8x32xf32, #tpu.memory_space<vmem>>, vector<1x8x32xf32>
    %11 = vector.shape_cast %10 : vector<1x8x32xf32> to vector<8x32xf32>
    %cst_12 = arith.constant dense<0.000000e+00> : vector<8x32xf32>
    %12 = tpu.matmul %7, %11, %cst_12 {dimension_numbers = #tpu.dot_dimension_numbers<[1], [0], [0], [1], [0, 0, 1, 1], [], []>} : vector<8x8xf32>, vector<8x32xf32>, vector<8x32xf32> -> vector<8x32xf32>
    %13 = arith.addf %9, %12 : vector<8x32xf32>
    %c0_13 = arith.constant 0 : index
    %c0_14 = arith.constant 0 : index
    %c0_15 = arith.constant 0 : index
    %14 = vector.load %arg6[%c0_13, %c0_14, %c0_15] : memref<1x8x32xf32, #tpu.memory_space<vmem>>, vector<1x8x32xf32>
    %15 = vector.shape_cast %14 : vector<1x8x32xf32> to vector<8x32xf32>
    %16 = vector.shape_cast %13 : vector<8x32xf32> to vector<1x8x32xf32>
    tpu.vector_store %arg6[%c0_13, %c0_14, %c0_15], %16 {strides = array<i32>} : memref<1x8x32xf32, #tpu.memory_space<vmem>>, vector<1x8x32xf32>,
    return
  }
  func.func @transform_0(%arg0: i32, %arg1: i32, %arg2: i32) -> (i32, i32, i32) {
    %c0_i32 = arith.constant 0 : i32
    %c0_i32_0 = arith.constant 0 : i32
    return %arg0, %arg1, %c0_i32 : i32, i32, i32
  }
  func.func @transform_1(%arg0: i32, %arg1: i32, %arg2: i32) -> (i32, i32, i32) {
    %c0_i32 = arith.constant 0 : i32
    %c0_i32_0 = arith.constant 0 : i32
    return %arg0, %arg2, %c0_i32 : i32, i32, i32
  }
  func.func @transform_2(%arg0: i32, %arg1: i32, %arg2: i32) -> (i32, i32, i32) {
    %c0_i32 = arith.constant 0 : i32
    %c0_i32_0 = arith.constant 0 : i32
    return %arg0, %arg2, %c0_i32 : i32, i32, i32
  }
  func.func @transform_3(%arg0: i32, %arg1: i32, %arg2: i32) -> (i32, i32, i32) {
    %c0_i32 = arith.constant 0 : i32
    %c0_i32_0 = arith.constant 0 : i32
    return %arg0, %arg1, %c0_i32 : i32, i32, i32
  }
}

</mosaic_0001>

<bundles_post_ra>
// kernel: tpu_custom_call.1
= control target key start
LH: loop header
LB: loop body
LE: loop exit
PB: predicated region body
PF: predicated region fallthrough
CT: control target
= control target key end

     0   :  { %s951_s0 = inlined_call_operand.hbm [shape: f32[2,8,32], index: 0, kind: input, shape index: {}]   ;;  %s952_s1 = inlined_call_operand.hbm [shape: f32[2,8,32], index: 1, kind: input, shape index: {}]   ;;  %s953_s2 = inlined_call_operand.hbm [shape: f32[2,8,32], index: 2, kind: input, shape index: {}]   ;;  %s954_s3 = inlined_call_operand.hbm [shape: f32[2,8,32], index: 3, kind: output, shape index: {}]  }
   0x1   :  { %957 = sst [smem:[#allocation15_spill]] %s952_s1 }
   0x2   :  { %8 = vsyncpa [#allocation3], 0 }
   0x3   :  { %10 = vsyncpa [#allocation3 + $0x1], 0 }
   0x4   :  { %11 = vsyncpa [#allocation6], 0 }
   0x5   :  { %13 = vsyncpa [#allocation6 + $0x1], 0 }
   0x6   :  { %14 = vsyncpa [#allocation4], 0 }
   0x7   :  { %16 = vsyncpa [#allocation4 + $0x1], 0  ;;  %s795_s12 = smov 0   ;;  %s797_s13 = smov 0  }
   0x8   :  { %s799_s14 = smov 0   ;;  %s801_s15 = smov 0  }
   0x9   :  { %s803_s16 = smov 0   ;;  %s805_s17 = smov 0  }
   0xa LB: > { %958 = sst [smem:[#allocation12_spill]] %s768_s16  ;;  %s826_s18 = sadd.s32 4294967295, %s772_s17   ;;  %s772_s17 = sphi %s805_s17, %s22_s17   ;;  %s768_s16 = sphi %s803_s16, %s970_s16   ;;  %s764_s15 = sphi %s801_s15, %s969_s15   ;;  %s760_s14 = sphi %s799_s14, %s973_s14   ;;  %s756_s13 = sphi %s797_s13, %s972_s13   ;;  %s752_s12 = sphi %s795_s12, %s971_s12  }
   0xb   : > { %s502_s19 = sadd.s32 4294967294, %s772_s17   ;;  %s41_s20 = sadd.s32 1, %s768_s16 }
   0xc   : > { %s50_s21 = sadd.s32 1, %s760_s14  ;;  %p43_p0 = scmp.ge.s32.totalorder %s41_s20, 2 }
   0xd   : > { %p57_p1 = scmp.ne.s32.totalorder %s760_s14, %s756_s13  ;;  %p58_p2 = scmp.eq.s32.totalorder %s772_s17, 0 }
   0xe   : > { %p63_p3 = scmp.ne.s32.totalorder %s756_s13, %s752_s12  ;;  %s975_s20 = smov (%p43_p0, %s41_s20), 0 }
   0xf   : > { %959 = sst [smem:[#allocation13_spill]] %s975_s20  ;;  %p838_p4 = por %p58_p2, %p57_p1 }
  0x10   : > { %p64_p5 = scmp.eq.s32.totalorder %s826_s18, 0  ;;  %s45_s23 = ssub.s32 %s768_s16, %s975_s20 }
  0x11   : > { %p145_p6 = scmp.eq.s32.totalorder %s826_s18, 1  ;;  %p48_p7 = scmp.eq.s32.totalorder %s45_s23, 0 }
  0x12   : > { %p846_p8 = por %p64_p5, %p63_p3  ;;  %p151_p10 = scmp.eq.s32.totalorder %s502_s19, 1 }
  0x13   : > { %p850_p9 = por %p145_p6, %p57_p1  ;;  %p504_p12 = scmp.ge.s32.totalorder %s772_s17, 2 }
  0x14   : > { %s855_s26 = scalar_select %p48_p7, %s760_s14, %s50_s21  }
  0x15   : > { %p857_p11 = por %p151_p10, %p63_p3  ;;  %p545_p13 = scmp.lt.s32.totalorder %s772_s17, 2 }
  0x16   : > { %963 = sst [smem:[#allocation14_spill]] %s855_s26  ;;  %s171_s28 = sand.u32 1, %s760_s14  }
  0x17   : > { %s505_s29 = sshll.u32 %s171_s28, 3  ;;  %s506_s30 = sshll.u32 %s768_s16, 3 }
  0x18   : > { %p867_p0 = pnand %p545_p13, %p838_p4  ;;  %s191_s5 = sand.u32 1, %s772_s17  }
  0x19   : > { %s966_s1 = sld [smem:[#allocation15_spill]]  ;;  %s195_s10 = scalar_lea.vmem [#allocation5], %s505_s29 }
  0x1a   : > { %s204_s11 = sshll.u32 %s195_s10, 4  ;;  %s192_s19 = scalar_lea.sflag [#allocation6], %s191_s5  ;;  %s205_s11 = int_to_ptr.vmem [resolvable:$true] %s204_s11 }
  0x1b   : > { %p511_p1 = scmp.ge.s32.totalorder %s772_s17, 1  ;;  %p229_p2 = scmp.lt.s32.totalorder %s772_s17, 3 }
  0x1c   : > { %s180_s6 = scalar_lea.hbm %s951_s0, %s506_s30  ;;  %s172_s10 = scalar_lea.sflag [#allocation3], %s171_s28 }
  0x1d   : > { %p879_p3 = pnand %p511_p1, %p229_p2  ;;  %s182_s7 = sshll.u32 %s180_s6, 4  ;;  %s183_s7 = int_to_ptr.hbm [resolvable:$true] %s182_s7 }
  0x1e   : > { %s215_s16 = scalar_lea.vmem [#allocation7], %s505_s29  ;;  %s896_s22 = sand.u32 (!%p879_p3), 1, %s756_s13  }
  0x1f   : > { %s200_s8 = scalar_lea.hbm %s966_s1, %s506_s30  ;;  %s224_s26 = sshll.u32 %s215_s16, 4  ;;  %s225_s26 = int_to_ptr.vmem [resolvable:$true] %s224_s26 }
  0x20   : > { %s202_s9 = sshll.u32 %s200_s8, 4  ;;  %s175_s8 = scalar_lea.vmem [#allocation2], %s505_s29  ;;  %s203_s9 = int_to_ptr.hbm [resolvable:$true] %s202_s9 }
  0x21   : > { %537 = dma.hbm_to_vmem [thread:$0]  (!%p867_p0), %s203_s9, 128, %s205_s11, %s192_s19  }
  0x22   : > { %s184_s1 = sshll.u32 %s175_s8, 4  ;;  %s220_s11 = scalar_lea.hbm %s953_s2, %s506_s30  ;;  %s185_s1 = int_to_ptr.vmem [resolvable:$true] %s184_s1 }
  0x23   : > { %534 = dma.hbm_to_vmem [thread:$0]  (!%p867_p0), %s183_s7, 128, %s185_s1, %s172_s10  }
  0x24   : > { %s222_s20 = sshll.u32 %s220_s11, 4  ;;  %233 = sbr.rel (%p879_p3) target bundleno = 306 (0x132), region = 32  ;;  %s223_s20 = int_to_ptr.hbm [resolvable:$true] %s222_s20 }
  0x25   : > { %540 = dma.hbm_to_vmem [thread:$0]  (!%p867_p0), %s223_s20, 128, %s225_s26, %s192_s19  }
  0x26   : > { %s512_s1 = sshll.u32 (!%p879_p3), %s896_s22, 3  ;;  %s236_s28 = scalar_lea.sflag (!%p879_p3), [#allocation3], %s896_s22 }
  0x27   : > { %s239_s23 = scalar_lea.vmem (!%p879_p3), [#allocation2], %s512_s1 }
  0x29   : > { %739 = dma.done.wait (%p846_p8), %s236_s28, 128  }
  0x2a   : > { %741 = vsyncadd (%p846_p8), %s236_s28, 4294967168  ;;  %s245_s16 = sand.u32 1, %s826_s18   ;;  %s249_s26 = scalar_lea.vmem [#allocation5], %s512_s1 }
  0x2b   : > { %s246_s20 = scalar_lea.sflag [#allocation6], %s245_s16 }
  0x2c   : > { %743 = dma.done.wait (%p846_p8), %s246_s20, 256  }
  0x2d   : > { %745 = vsyncadd (%p846_p8), %s246_s20, 4294967040  ;;  %vm297_vm0 = vcmask 261120   ;;  %v300_v0 = vld [vmem:[%s249_s26] sm:$0xff]  ;;  %v299_v1 = vld [vmem:[%s239_s23] sm:$0xff]  ;;  %s259_s29 = scalar_lea.vmem [#allocation7], %s512_s1  ;;  %s292_s30 = scalar_lea.vmem [#allocation8], %s512_s1 }
  0x2e   : > { %516 = vmatpush.xpose.msk.msra.mxu0 %vm297_vm0, %v300_v0  ;;  %v329_v2 = vld [vmem:[%s259_s29] sm:$0xff]  ;;  %v774_v3 = vmov 0.0   ;;  %vm330_vm1 = vcmask 64512   ;;  %s520_s18 = sshll.u32 %s764_s15, 3  ;;  %s370_s21 = sshll.u32 %s292_s30, 4  ;;  %s371_s21 = int_to_ptr.vmem [resolvable:$true] %s370_s21 }
  0x2f   : > { %349 = vmatpush.msra.mxu1 %v329_v2  ;;  %298 = vst.msk [vmem:[%s292_s30] sm:$0xff] %vm297_vm0, %v774_v3  ;;  %s368_s19 = scalar_lea.hbm %s954_s3, %s520_s18  ;;  %s357_s7 = scalar_lea.sflag [#allocation4], %s896_s22 }
  0x30   : > { %s372_s6 = sshll.u32 %s368_s19, 4  ;;  %s706_s9 = scalar_lea.hbm %s954_s3, 16  ;;  %s373_s6 = int_to_ptr.hbm [resolvable:$true] %s372_s6 }
  0x31   : > { %517 = vmatmul.msk.f32.vlgmr.msra.gmra.mxu0 %vm297_vm0, %v299_v1  ;;  %s700_s8 = sshra.s32 %s373_s6, 4  ;;  %s701_s8 = int_to_ptr.hbm [resolvable:$true] %s700_s8 }
  0x32   : > { %s702_s10 = scalar_lea.hbm %s701_s8, 8  ;;  %p707_p7 = scmp.lt.s32.totalorder %s701_s8, %s954_s3 }
  0x33   : > { %p703_p4 = scmp.ne.s32.totalorder %s701_s8, %s702_s10  ;;  %p708_p8 = scmp.lt.s32.totalorder %s706_s9, %s702_s10 }
  0x35   : > { %p704_p5 = pnand %p703_p4, %p850_p9  ;;  %p709_p10 = por %p708_p8, %p707_p7 }
  0x36   : > { %v328_v5 = vld [vmem:[%s292_s30] sm:$0xff] }
  0x37   : > { %p705_p6 = pneg %p704_p5 }
  0x39   : > { %p710_p13 = pnand %p709_p10, %p705_p6 }
  0xae   : > { %v325_v4 = vpop.f32.mrf.mxu0 }
  0xaf   : > { %518 = vmatmul.msk.f32.vlgmr.msra.gmra.mxu1 %vm330_vm1, %v325_v4 }
 0x12c   : > { %v351_v6 = vpop.f32.mrf.mxu1 }
 0x12d   : > { %v354_v7 = vadd.f32 %v351_v6, %v328_v5 }
 0x12f   : > { %355 = vst.msk [vmem:[%s292_s30] sm:$0xff] %vm297_vm0, %v354_v7 }
 0x130   : > { %713 = shalt.err (!%p710_p13)
}
 0x131   : > { %529 = dma.vmem_to_hbm [thread:$0]  (%p850_p9), %s371_s21, 128, %s373_s6, %s357_s7  }
 0x132 PF: > { %s384_s22 = sand.u32 1, %s752_s12   ;;  %p542_p0 = pnand %p504_p12, %p857_p11 }
 0x133   : > { %s385_s28 = scalar_lea.sflag [#allocation4], %s384_s22 }
 0x134   : > { %p543_p1 = pneg %p542_p0 }
 0x136   : > { %747 = dma.done.wait (%p543_p1), %s385_s28, 128  }
 0x137   : > { %749 = vsyncadd (%p543_p1), %s385_s28, 4294967168  ;;  %s22_s17 = sadd.s32 1, %s772_s17   ;;  %s968_s23 = sld [smem:[#allocation14_spill]] }
 0x138   : > { %p19_p2 = scmp.ge.s32.totalorder %s22_s17, 4   ;;  %s969_s15 = sld [smem:[#allocation12_spill]] }
 0x139   : > { %s970_s16 = sld [smem:[#allocation13_spill]]  ;;  %s971_s12 = smov %s756_s13 }
 0x13a   : > { %s972_s13 = smov %s760_s14  ;;  %21 = sbr.rel (!%p19_p2) target bundleno = 10 (0xa), region = 105 }
 0x13d   : > { %s973_s14 = smov %s968_s23 }
 0x13f   :  { %391 = vsyncpa [#allocation3], 1 }
 0x140   :  { %393 = vsyncpa [#allocation3 + $0x1], 1 }
 0x141   :  { %394 = vsyncpa [#allocation6], 1 }
 0x142   :  { %396 = vsyncpa [#allocation6 + $0x1], 1 }
 0x143   :  { %397 = vsyncpa [#allocation4], 1 }
 0x144   :  { %399 = vsyncpa [#allocation4 + $0x1], 1 }

</bundles_post_ra>
